<compile_context>
chip_gen: v5e
topology: v5e:2x2
jax: 0.10.0
libtpu: 0.0.40
codegen_flags: <defaults>
</compile_context>

<pallas_src>
import functools
import math

import jax
import jax.numpy as jnp
from jax.experimental import pallas as pl
from jax.experimental.pallas import tpu as pltpu


# ----------------------------------------------------------------------------
# Kernel
# ----------------------------------------------------------------------------
def _attention_head_kernel(x_ref, wqkv_ref, bqkv_ref, mask_ref, o_ref,
                           q_scr, k_scr, v_scr, m_scr, l_scr, acc_scr, *,
                           n_out_pad, use_bf16):
    # Grid: (batch blocks [parallel], kv chunks [arbitrary]).
    # x_ref:    (Bt, S, Din)                  batch block (same across kv steps)
    # wqkv_ref: (Din, 3*Dpad)                 fused [Wq/sqrt(S) | Wk | Wv] (Buffered(1))
    # bqkv_ref: (1, 3*Dpad)  f32              fused [bq/sqrt(S) | bk | bv]
    # mask_ref: (Bt, S, Ck) int8              nonzero => masked (fill with -1e9)
    # o_ref:    (Bt, S, Dpad)                 lane-dense padded output
    # scratch:  q/k/v (Bt,S,Dpad), m/l (Bt,S,1) f32, acc (Bt,S,Dpad) f32
    kv = pl.program_id(1)
    bt, s, din = x_ref.shape
    kv_chunk = mask_ref.shape[-1]

    @pl.when(kv == 0)
    def _project_and_init():
        # Fused QKV projection: fold (Bt, S) into the MXU M dimension.
        # S is padded to a multiple of 8 (16 bf16) -> this reshape is a free view.
        x2 = x_ref[...].reshape(bt * s, din)
        w = wqkv_ref[...]
        if use_bf16:
            x2 = x2.astype(jnp.bfloat16)      # no-op: wrapper streams x as bf16
            w = w.astype(jnp.bfloat16)
        # TODO(synk): on v7x an fp8 (e4m3) operand path here would double MXU
        # throughput and halve the weight/activation DMA again.
        qkv = jnp.dot(x2, w, preferred_element_type=jnp.float32) + bqkv_ref[...]
        qkv = qkv.reshape(bt, s, 3 * n_out_pad)
        q_scr[...] = qkv[:, :, 0 * n_out_pad:1 * n_out_pad].astype(q_scr.dtype)
        k_scr[...] = qkv[:, :, 1 * n_out_pad:2 * n_out_pad].astype(k_scr.dtype)
        v_scr[...] = qkv[:, :, 2 * n_out_pad:3 * n_out_pad].astype(v_scr.dtype)
        m_scr[...] = jnp.full_like(m_scr, -jnp.inf)
        l_scr[...] = jnp.zeros_like(l_scr)
        acc_scr[...] = jnp.zeros_like(acc_scr)

    start = pl.multiple_of(kv * kv_chunk, kv_chunk)
    q = q_scr[...]
    k_c = k_scr[:, pl.ds(start, kv_chunk), :]
    v_c = v_scr[:, pl.ds(start, kv_chunk), :]

    # scores = (q / sqrt(S)) @ k^T  (the 1/sqrt(S) scale is folded into Wq/bq).
    scores = jnp.einsum("bqd,bkd->bqk", q, k_c,
                        preferred_element_type=jnp.float32)
    # masked_fill(attention_mask, -1e9): "set" semantics (not additive bias) so
    # fully-masked rows reproduce the reference's uniform softmax over -1e9.
    scores = jnp.where(mask_ref[...] != 0, jnp.float32(-1e9), scores)

    # Online softmax (f32 statistics; exp on the EUP slot).
    m_prev = m_scr[...]
    m_new = jnp.maximum(m_prev, jnp.max(scores, axis=-1, keepdims=True))
    alpha = jnp.exp(m_prev - m_new)
    p = jnp.exp(scores - m_new)
    l_scr[...] = alpha * l_scr[...] + jnp.sum(p, axis=-1, keepdims=True)
    acc_scr[...] = alpha * acc_scr[...] + jnp.einsum(
        "bqk,bkd->bqd", p.astype(v_c.dtype), v_c,
        preferred_element_type=jnp.float32)
    m_scr[...] = m_new

    @pl.when(kv == pl.num_programs(1) - 1)
    def _finalize():
        l = l_scr[...]
        inv = pl.reciprocal(l, approx=True)
        inv = inv * (2.0 - l * inv)           # one Newton step -> ~f32 accuracy
        o_ref[...] = (acc_scr[...] * inv).astype(o_ref.dtype)


# ----------------------------------------------------------------------------
# VMEM budgeting / tiling policy
# ----------------------------------------------------------------------------
def _round_up(x, m):
    return (x + m - 1) // m * m


def _vmem_limit_bytes():
    """Per-generation scoped-VMEM limit (well above defaults, below physical)."""
    phys = 64 << 20                            # conservative fallback = v7x
    try:
        cap = getattr(pltpu.get_tpu_info(), "vmem_capacity_bytes", None)
        if cap:
            phys = int(cap)
    except Exception:
        pass
    # v5e/v6e (128 MiB): ~100 MiB; v7x (64 MiB): ~51 MiB (headroom for compiler scratch).
    return min(phys * 4 // 5, 100 << 20)


def _estimate_vmem_bytes(bb, s, din, dpad, kvc, *, x_bytes, w_bytes, out_bytes,
                         cmp_bytes):
    """Rough per-grid-step VMEM footprint for the kernel above."""
    weights = din * 3 * dpad * w_bytes + 3 * dpad * 4   # single-buffered (Buffered(1))
    io = 2 * bb * s * din * x_bytes                     # x block, double-buffered
    io += 2 * bb * s * kvc * 1                          # int8 mask block, double-buffered
    io += 2 * bb * s * dpad * out_bytes                 # output block, double-buffered
    scr = 3 * bb * s * dpad * cmp_bytes                 # q/k/v scratch
    scr += 2 * bb * s * 128 * 4                         # m/l scratch (lane-padded)
    scr += bb * s * dpad * 4                            # f32 output accumulator
    tmp = bb * s * 3 * dpad * 4                         # projection result (f32)
    tmp += 3 * bb * s * kvc * 4                         # scores / p / select temporaries
    return weights + io + scr + tmp


_KV_CHUNKS = (1024, 512, 256, 128)


def _plan_tiling(B, s, din, dpad, budget, *, x_bytes, w_bytes, out_bytes,
                 cmp_bytes):
    """Pick (block_b, kv_chunk): biggest tile that fits the VMEM budget."""
    divs = sorted((d for d in range(1, B + 1) if B % d == 0), reverse=True)
    min_steps = 2 if B >= 2 else 1             # keep both v7x TensorCores fed
    kv_opts = [s] + [c for c in _KV_CHUNKS if c < s and s % c == 0]
    for kvc in kv_opts:                        # prefer single-pass, then chunked
        fitting = [d for d in divs if B // d >= min_steps and _estimate_vmem_bytes(
            d, s, din, dpad, kvc, x_bytes=x_bytes, w_bytes=w_bytes,
            out_bytes=out_bytes, cmp_bytes=cmp_bytes) <= budget]
        if fitting:
            top = max(fitting)
            # Don't shrink the tile more than 4x just for alignment preferences.
            cands = [d for d in fitting if d * 4 >= top]
            return max(cands, key=lambda d: (((d * s) % 256) == 0,   # MXU M = k*256
                                             (B // d) % 2 == 0,      # even grid
                                             d)), kvc                # biggest tile
    # Nothing fits the budget: best effort (correctness over performance).
    # TODO(synk): for very long S not divisible by 128, pad S to a multiple of
    # 128 in the wrapper so a small KV chunk becomes available.
    return 1, (kv_opts[-1] if kv_opts else s)


# ----------------------------------------------------------------------------
# Wrapper
# ----------------------------------------------------------------------------
def attention_head_pallas(x, wq, bq, wk, bk, wv, bv, attention_mask, *,
                          block_b=None, kv_chunk=None, use_bf16_mxu=False,
                          out_dtype=None):
    """x: (B, S, Din) f32; w*: (Dout, Din); b*: (Dout,); mask: (B, S, S) bool."""
    B, S, Din = x.shape
    Dout = wq.shape[0]
    out_dtype = jnp.dtype(out_dtype or x.dtype)
    scale = float(S) ** 0.5           # query.size(1) ** 0.5 in the reference
    inv_scale = 1.0 / scale

    # Lane-dense output: pad Dout up to a multiple of 128 (unmasked full-lane vst).
    Dpad = _round_up(Dout, 128)
    pad_d = Dpad - Dout

    def prep_w(w):                    # (Dout, Din) -> (Din, Dpad), zero-padded
        wt = w.T
        return jnp.pad(wt, ((0, 0), (0, pad_d))) if pad_d else wt

    def prep_b(b):                    # (Dout,) -> (Dpad,), zero-padded
        return jnp.pad(b, (0, pad_d)) if pad_d else b

    # Fold 1/sqrt(S) into the Q projection (one-time constant fold on weights).
    wqkv = jnp.concatenate([prep_w(wq) * inv_scale, prep_w(wk), prep_w(wv)],
                           axis=1)                               # (Din, 3*Dpad)
    bqkv = jnp.concatenate([prep_b(bq) * inv_scale, prep_b(bk),
                            prep_b(bv)])[None, :]                # (1, 3*Dpad) f32

    # bf16 fast path (valid on v5e/v6e/v7x: MXU is bf16-native; softmax stays f32).
    # x is cast in the wrapper so the HBM->VMEM activation stream is halved too.
    x_dtype = jnp.bfloat16 if use_bf16_mxu else x.dtype
    cmp_dtype = jnp.bfloat16 if use_bf16_mxu else jnp.float32
    if use_bf16_mxu:
        wqkv = wqkv.astype(jnp.bfloat16)
    x_in = x.astype(x_dtype)

    # Pad S so (bt,s,din) <-> (bt*s,din) reshapes are tile-aligned free views.
    s_align = 16 if use_bf16_mxu else 8
    Spad = _round_up(S, s_align)
    pad_s = Spad - S
    # int8 mask: 1/4 of an int32 stream (note: below S=128 lanes the int8 tile
    # pads to the same footprint, so this is a wash at tiny S).
    # TODO(synk): if the mask is structured (causal/padding) build it in-kernel
    # from broadcasted_iota and drop the (B,S,S) stream entirely.
    mask_i8 = attention_mask.astype(jnp.int8)
    if pad_s:
        x_in = jnp.pad(x_in, ((0, 0), (0, pad_s), (0, 0)))
        mask_i8 = jnp.pad(mask_i8, ((0, 0), (0, pad_s), (0, pad_s)),
                          constant_values=1)   # padded keys masked out

    vmem_limit = _vmem_limit_bytes()
    plan_bb, plan_kv = _plan_tiling(
        B, Spad, Din, Dpad, int(vmem_limit * 0.9),
        x_bytes=jnp.dtype(x_dtype).itemsize, w_bytes=wqkv.dtype.itemsize,
        out_bytes=out_dtype.itemsize, cmp_bytes=jnp.dtype(cmp_dtype).itemsize)
    if block_b is None:
        block_b = plan_bb
    if kv_chunk is None:
        kv_chunk = plan_kv
    assert B % block_b == 0, "block_b must divide B"
    assert Spad % kv_chunk == 0, "kv_chunk must divide padded S"
    grid = (B // block_b, Spad // kv_chunk)

    kernel = functools.partial(_attention_head_kernel, n_out_pad=Dpad,
                               use_bf16=use_bf16_mxu)

    def build_and_call(single_buffer_weights):
        w_kw = {}
        if single_buffer_weights and hasattr(pl, "Buffered"):
            # Grid-invariant weights/bias: don't double-buffer them in VMEM.
            w_kw = dict(pipeline_mode=pl.Buffered(1))
        grid_spec = pltpu.PrefetchScalarGridSpec(
            num_scalar_prefetch=0,
            grid=grid,
            in_specs=[
                # TODO(synk): on v5e, sweep pipeline_mode=pl.Buffered(3) on x and
                # mask if xprof shows exposed input DMA at the chosen block size.
                pl.BlockSpec((block_b, Spad, Din), lambda b, kv: (b, 0, 0)),    # x
                pl.BlockSpec((Din, 3 * Dpad), lambda b, kv: (0, 0), **w_kw),    # fused W
                pl.BlockSpec((1, 3 * Dpad), lambda b, kv: (0, 0), **w_kw),      # fused b
                pl.BlockSpec((block_b, Spad, kv_chunk), lambda b, kv: (b, 0, kv)),  # mask
            ],
            out_specs=pl.BlockSpec((block_b, Spad, Dpad), lambda b, kv: (b, 0, 0)),
            scratch_shapes=[
                pltpu.VMEM((block_b, Spad, Dpad), cmp_dtype),    # q
                pltpu.VMEM((block_b, Spad, Dpad), cmp_dtype),    # k
                pltpu.VMEM((block_b, Spad, Dpad), cmp_dtype),    # v
                pltpu.VMEM((block_b, Spad, 1), jnp.float32),     # running max
                pltpu.VMEM((block_b, Spad, 1), jnp.float32),     # running denom
                pltpu.VMEM((block_b, Spad, Dpad), jnp.float32),  # output accumulator
            ],
        )
        return pl.pallas_call(
            kernel,
            out_shape=jax.ShapeDtypeStruct((B, Spad, Dpad), out_dtype),
            grid_spec=grid_spec,
            compiler_params=pltpu.CompilerParams(
                dimension_semantics=("parallel", "arbitrary"),
                vmem_limit_bytes=vmem_limit),
        )(x_in, wqkv, bqkv, mask_i8)

    try:
        out_padded = build_and_call(True)
    except Exception:
        # pl.Buffered(1) not supported on this JAX version -> default buffering.
        out_padded = build_and_call(False)

    if pad_s or pad_d:
        # TODO(synk): if the consumer accepts the lane-padded (Dpad) layout,
        # skip this slice (it costs an extra HBM read+write pass for Dout<128).
        out_padded = out_padded[:, :S, :Dout]
    return out_padded


def attention_head_ref(x, wq, bq, wk, bk, wv, bv, attention_mask):
    """Plain-JAX reference mirroring the PyTorch forward."""
    q = jnp.einsum("bsd,od->bso", x, wq) + bq
    k = jnp.einsum("bsd,od->bso", x, wk) + bk
    v = jnp.einsum("bsd,od->bso", x, wv) + bv
    scale = q.shape[1] ** 0.5
    scores = jnp.einsum("bqo,bko->bqk", q, k) / scale
    scores = jnp.where(attention_mask, -1e9, scores)
    attn = jax.nn.softmax(scores, axis=-1)
    return jnp.einsum("bqk,bko->bqo", attn, v)


def _make_inputs(key, B, S, Din, Dout):
    k_x, k_wq, k_bq, k_wk, k_bk, k_wv, k_bv, k_m = jax.random.split(key, 8)
    bound = 1.0 / math.sqrt(Din)
    wq = jax.random.uniform(k_wq, (Dout, Din), jnp.float32, -bound, bound)
    bq = jax.random.uniform(k_bq, (Dout,), jnp.float32, -bound, bound)
    wk = jax.random.uniform(k_wk, (Dout, Din), jnp.float32, -bound, bound)
    bk = jax.random.uniform(k_bk, (Dout,), jnp.float32, -bound, bound)
    wv = jax.random.uniform(k_wv, (Dout, Din), jnp.float32, -bound, bound)
    bv = jax.random.uniform(k_bv, (Dout,), jnp.float32, -bound, bound)
    x = jax.random.normal(k_x, (B, S, Din), jnp.float32)
    mask = jax.random.uniform(k_m, (B, S, S)) < 0.25   # True => masked out
    return x, wq, bq, wk, bk, wv, bv, mask


if __name__ == "__main__":
    key = jax.random.PRNGKey(0)
    k1, k2 = jax.random.split(key)

    # --- Demo shapes from the module: batch=2, seq=8, dim_inp=dim_out=32. ---
    B, S, DIM_INP, DIM_OUT = 2, 8, 32, 32
    x, wq, bq, wk, bk, wv, bv, mask = _make_inputs(k1, B, S, DIM_INP, DIM_OUT)
    ref = attention_head_ref(x, wq, bq, wk, bk, wv, bv, mask)

    # Exact (f32 MXU) path, planner-chosen tiling.
    out = jax.block_until_ready(
        attention_head_pallas(x, wq, bq, wk, bk, wv, bv, mask))
    assert out.shape == (B, S, DIM_OUT)
    assert jnp.allclose(out, ref, atol=5e-3, rtol=5e-3), "mismatch vs reference (f32)"

    # bf16-MXU-operand fast path (valid on v5e/v6e/v7x; f32 accumulation/softmax).
    out_bf16 = jax.block_until_ready(
        attention_head_pallas(x, wq, bq, wk, bk, wv, bv, mask, use_bf16_mxu=True))
    assert out_bf16.shape == (B, S, DIM_OUT)
    assert jnp.allclose(out_bf16, ref, atol=5e-2, rtol=5e-2), "mismatch vs reference (bf16)"

    # Flash-style chunked KV path (forced small chunk to exercise the online
    # softmax / second grid axis that kicks in automatically at long S).
    B2, S2, DIN2, DOUT2 = 2, 256, 128, 64
    x2, wq2, bq2, wk2, bk2, wv2, bv2, mask2 = _make_inputs(k2, B2, S2, DIN2, DOUT2)
    ref2 = attention_head_ref(x2, wq2, bq2, wk2, bk2, wv2, bv2, mask2)
    out2 = jax.block_until_ready(
        attention_head_pallas(x2, wq2, bq2, wk2, bk2, wv2, bv2, mask2,
                              block_b=1, kv_chunk=128))
    assert out2.shape == (B2, S2, DOUT2)
    assert jnp.allclose(out2, ref2, atol=5e-3, rtol=5e-3), "mismatch vs reference (chunked)"

    print("KERNEL_OK")
</pallas_src>

<mosaic_0001>
module attributes {stable_mosaic.version = 11 : i64} {
  func.func @_attention_head_kernel(%arg0: i32, %arg1: i32, %arg2: memref<1x8x32xf32, #tpu.memory_space<vmem>>, %arg3: memref<32x384xf32, #tpu.memory_space<vmem>>, %arg4: memref<1x384xf32, #tpu.memory_space<vmem>>, %arg5: memref<1x8x8xi8, #tpu.memory_space<vmem>>, %arg6: memref<1x8x128xf32, #tpu.memory_space<vmem>>, %arg7: memref<1x8x128xf32, #tpu.memory_space<vmem>>, %arg8: memref<1x8x128xf32, #tpu.memory_space<vmem>>, %arg9: memref<1x8x128xf32, #tpu.memory_space<vmem>>, %arg10: memref<1x8x1xf32, #tpu.memory_space<vmem>>, %arg11: memref<1x8x1xf32, #tpu.memory_space<vmem>>, %arg12: memref<1x8x128xf32, #tpu.memory_space<vmem>>) attributes {dimension_semantics = [#tpu.dimension_semantics<parallel>, #tpu.dimension_semantics<arbitrary>], iteration_bounds = array<i64: 2, 1>, scalar_prefetch = 0 : i64, scratch_operands = 6 : i64, tpu.core_type = #tpu.core_type<tc>, window_params = [{transform_indices = @transform_0, window_bounds = array<i64: 1, 8, 32>}, {pipeline_mode = #tpu.pipeline_mode<synchronous>, transform_indices = @transform_1, window_bounds = array<i64: 32, 384>}, {pipeline_mode = #tpu.pipeline_mode<synchronous>, transform_indices = @transform_2, window_bounds = array<i64: 1, 384>}, {transform_indices = @transform_3, window_bounds = array<i64: 1, 8, 8>}, {transform_indices = @transform_4, window_bounds = array<i64: 1, 8, 128>}]} {
    %c0_i32 = arith.constant 0 : i32
    %0 = arith.cmpi eq, %arg1, %c0_i32 : i32
    %1 = arith.extui %0 : i1 to i32
    %c0_i32_0 = arith.constant 0 : i32
    %2 = arith.cmpi ne, %1, %c0_i32_0 : i32
    scf.if %2 {
      %c0_34 = arith.constant 0 : index
      %c0_35 = arith.constant 0 : index
      %c0_36 = arith.constant 0 : index
      %41 = vector.load %arg2[%c0_34, %c0_35, %c0_36] : memref<1x8x32xf32, #tpu.memory_space<vmem>>, vector<1x8x32xf32>
      %42 = vector.shape_cast %41 : vector<1x8x32xf32> to vector<8x32xf32>
      %c0_37 = arith.constant 0 : index
      %c0_38 = arith.constant 0 : index
      %43 = vector.load %arg3[%c0_37, %c0_38] : memref<32x384xf32, #tpu.memory_space<vmem>>, vector<32x384xf32>
      %cst_39 = arith.constant dense<0.000000e+00> : vector<8x384xf32>
      %44 = tpu.matmul %42, %43, %cst_39 {dimension_numbers = #tpu.dot_dimension_numbers<[1], [0], [0], [1], [0, 0, 1, 1], [], []>} : vector<8x32xf32>, vector<32x384xf32>, vector<8x384xf32> -> vector<8x384xf32>
      %c0_40 = arith.constant 0 : index
      %c0_41 = arith.constant 0 : index
      %45 = vector.load %arg4[%c0_40, %c0_41] : memref<1x384xf32, #tpu.memory_space<vmem>>, vector<1x384xf32>
      %46 = vector.broadcast %45 : vector<1x384xf32> to vector<8x384xf32>
      %47 = arith.addf %44, %46 : vector<8x384xf32>
      %48 = vector.shape_cast %47 : vector<8x384xf32> to vector<1x8x384xf32>
      %49 = vector.extract_strided_slice %48 {offsets = [0, 0, 0], sizes = [1, 8, 128], strides = [1, 1, 1]} : vector<1x8x384xf32> to vector<1x8x128xf32>
      %c0_42 = arith.constant 0 : index
      %c0_43 = arith.constant 0 : index
      %c0_44 = arith.constant 0 : index
      %50 = vector.load %arg7[%c0_42, %c0_43, %c0_44] : memref<1x8x128xf32, #tpu.memory_space<vmem>>, vector<1x8x128xf32>
      tpu.vector_store %arg7[%c0_42, %c0_43, %c0_44], %49 {strides = array<i32>} : memref<1x8x128xf32, #tpu.memory_space<vmem>>, vector<1x8x128xf32>,
      %51 = vector.extract_strided_slice %48 {offsets = [0, 0, 128], sizes = [1, 8, 128], strides = [1, 1, 1]} : vector<1x8x384xf32> to vector<1x8x128xf32>
      %c0_45 = arith.constant 0 : index
      %c0_46 = arith.constant 0 : index
      %c0_47 = arith.constant 0 : index
      %52 = vector.load %arg8[%c0_45, %c0_46, %c0_47] : memref<1x8x128xf32, #tpu.memory_space<vmem>>, vector<1x8x128xf32>
      tpu.vector_store %arg8[%c0_45, %c0_46, %c0_47], %51 {strides = array<i32>} : memref<1x8x128xf32, #tpu.memory_space<vmem>>, vector<1x8x128xf32>,
      %53 = vector.extract_strided_slice %48 {offsets = [0, 0, 256], sizes = [1, 8, 128], strides = [1, 1, 1]} : vector<1x8x384xf32> to vector<1x8x128xf32>
      %c0_48 = arith.constant 0 : index
      %c0_49 = arith.constant 0 : index
      %c0_50 = arith.constant 0 : index
      %54 = vector.load %arg9[%c0_48, %c0_49, %c0_50] : memref<1x8x128xf32, #tpu.memory_space<vmem>>, vector<1x8x128xf32>
      tpu.vector_store %arg9[%c0_48, %c0_49, %c0_50], %53 {strides = array<i32>} : memref<1x8x128xf32, #tpu.memory_space<vmem>>, vector<1x8x128xf32>,
      %cst_51 = arith.constant 0xFF800000 : f32
      %55 = vector.broadcast %cst_51 : f32 to vector<1x8x1xf32>
      %c0_52 = arith.constant 0 : index
      %c0_53 = arith.constant 0 : index
      %c0_54 = arith.constant 0 : index
      %56 = vector.load %arg10[%c0_52, %c0_53, %c0_54] : memref<1x8x1xf32, #tpu.memory_space<vmem>>, vector<1x8x1xf32>
      tpu.vector_store %arg10[%c0_52, %c0_53, %c0_54], %55 {strides = array<i32>} : memref<1x8x1xf32, #tpu.memory_space<vmem>>, vector<1x8x1xf32>,
      %cst_55 = arith.constant 0.000000e+00 : f32
      %57 = vector.broadcast %cst_55 : f32 to vector<1x8x1xf32>
      %c0_56 = arith.constant 0 : index
      %c0_57 = arith.constant 0 : index
      %c0_58 = arith.constant 0 : index
      %58 = vector.load %arg11[%c0_56, %c0_57, %c0_58] : memref<1x8x1xf32, #tpu.memory_space<vmem>>, vector<1x8x1xf32>
      tpu.vector_store %arg11[%c0_56, %c0_57, %c0_58], %57 {strides = array<i32>} : memref<1x8x1xf32, #tpu.memory_space<vmem>>, vector<1x8x1xf32>,
      %cst_59 = arith.constant 0.000000e+00 : f32
      %59 = vector.broadcast %cst_59 : f32 to vector<1x8x128xf32>
      %c0_60 = arith.constant 0 : index
      %c0_61 = arith.constant 0 : index
      %c0_62 = arith.constant 0 : index
      %60 = vector.load %arg12[%c0_60, %c0_61, %c0_62] : memref<1x8x128xf32, #tpu.memory_space<vmem>>, vector<1x8x128xf32>
      tpu.vector_store %arg12[%c0_60, %c0_61, %c0_62], %59 {strides = array<i32>} : memref<1x8x128xf32, #tpu.memory_space<vmem>>, vector<1x8x128xf32>,
    } else {
    }
    %c8_i32 = arith.constant 8 : i32
    %3 = arith.muli %arg1, %c8_i32 : i32
    %4 = tpu.assume_multiple %3, 8 : i32
    %c0 = arith.constant 0 : index
    %c0_1 = arith.constant 0 : index
    %c0_2 = arith.constant 0 : index
    %5 = vector.load %arg7[%c0, %c0_1, %c0_2] : memref<1x8x128xf32, #tpu.memory_space<vmem>>, vector<1x8x128xf32>
    %c0_3 = arith.constant 0 : index
    %6 = arith.index_cast %4 : i32 to index
    %c0_4 = arith.constant 0 : index
    %7 = vector.load %arg8[%c0_3, %6, %c0_4] : memref<1x8x128xf32, #tpu.memory_space<vmem>>, vector<1x8x128xf32>
    %c0_5 = arith.constant 0 : index
    %8 = arith.index_cast %4 : i32 to index
    %c0_6 = arith.constant 0 : index
    %9 = vector.load %arg9[%c0_5, %8, %c0_6] : memref<1x8x128xf32, #tpu.memory_space<vmem>>, vector<1x8x128xf32>
    "tpu.trace_start"() <{level = 10 : i32, message = "bqd,bkd->bqk"}> : () -> ()
    %cst = arith.constant dense<0.000000e+00> : vector<1x8x8xf32>
    %10 = tpu.matmul %5, %7, %cst {dimension_numbers = #tpu.dot_dimension_numbers<[2], [2], [1], [1], [0, 0, 0, 1, 1, 1], [0], [0]>} : vector<1x8x128xf32>, vector<1x8x128xf32>, vector<1x8x8xf32> -> vector<1x8x8xf32>
    "tpu.trace_stop"() : () -> ()
    %c0_7 = arith.constant 0 : index
    %c0_8 = arith.constant 0 : index
    %c0_9 = arith.constant 0 : index
    %11 = vector.load %arg5[%c0_7, %c0_8, %c0_9] : memref<1x8x8xi8, #tpu.memory_space<vmem>>, vector<1x8x8xi8>
    %c0_i8 = arith.constant 0 : i8
    %12 = vector.broadcast %c0_i8 : i8 to vector<1x8x8xi8>
    %13 = arith.cmpi ne, %11, %12 : vector<1x8x8xi8>
    %cst_10 = arith.constant -1.000000e+09 : f32
    %14 = vector.broadcast %cst_10 : f32 to vector<1x8x8xf32>
    %15 = arith.select %13, %14, %10 : vector<1x8x8xi1>, vector<1x8x8xf32>
    %c0_11 = arith.constant 0 : index
    %c0_12 = arith.constant 0 : index
    %c0_13 = arith.constant 0 : index
    %16 = vector.load %arg10[%c0_11, %c0_12, %c0_13] : memref<1x8x1xf32, #tpu.memory_space<vmem>>, vector<1x8x1xf32>
    %cst_14 = arith.constant dense<0xFF800000> : vector<1x8xf32>
    %17 = vector.multi_reduction <maximumf>, %15, %cst_14 [2] : vector<1x8x8xf32> to vector<1x8xf32>
    %18 = vector.shape_cast %17 : vector<1x8xf32> to vector<1x8x1xf32>
    %19 = arith.maximumf %16, %18 : vector<1x8x1xf32>
    %20 = arith.subf %16, %19 : vector<1x8x1xf32>
    %21 = math.exp %20 : vector<1x8x1xf32>
    %22 = vector.broadcast %19 : vector<1x8x1xf32> to vector<1x8x8xf32>
    %23 = arith.subf %15, %22 : vector<1x8x8xf32>
    %24 = math.exp %23 : vector<1x8x8xf32>
    %c0_15 = arith.constant 0 : index
    %c0_16 = arith.constant 0 : index
    %c0_17 = arith.constant 0 : index
    %25 = vector.load %arg11[%c0_15, %c0_16, %c0_17] : memref<1x8x1xf32, #tpu.memory_space<vmem>>, vector<1x8x1xf32>
    %26 = arith.mulf %21, %25 : vector<1x8x1xf32>
    %cst_18 = arith.constant dense<0.000000e+00> : vector<1x8xf32>
    %27 = vector.multi_reduction <add>, %24, %cst_18 [2] : vector<1x8x8xf32> to vector<1x8xf32>
    %28 = vector.shape_cast %27 : vector<1x8xf32> to vector<1x8x1xf32>
    %29 = arith.addf %26, %28 : vector<1x8x1xf32>
    %c0_19 = arith.constant 0 : index
    %c0_20 = arith.constant 0 : index
    %c0_21 = arith.constant 0 : index
    %30 = vector.load %arg11[%c0_19, %c0_20, %c0_21] : memref<1x8x1xf32, #tpu.memory_space<vmem>>, vector<1x8x1xf32>
    tpu.vector_store %arg11[%c0_19, %c0_20, %c0_21], %29 {strides = array<i32>} : memref<1x8x1xf32, #tpu.memory_space<vmem>>, vector<1x8x1xf32>,
    %c0_22 = arith.constant 0 : index
    %c0_23 = arith.constant 0 : index
    %c0_24 = arith.constant 0 : index
    %31 = vector.load %arg12[%c0_22, %c0_23, %c0_24] : memref<1x8x128xf32, #tpu.memory_space<vmem>>, vector<1x8x128xf32>
    %32 = vector.broadcast %21 : vector<1x8x1xf32> to vector<1x8x128xf32>
    %33 = arith.mulf %32, %31 : vector<1x8x128xf32>
    "tpu.trace_start"() <{level = 10 : i32, message = "bqk,bkd->bqd"}> : () -> ()
    %cst_25 = arith.constant dense<0.000000e+00> : vector<1x8x128xf32>
    %34 = tpu.matmul %24, %9, %cst_25 {dimension_numbers = #tpu.dot_dimension_numbers<[2], [1], [1], [2], [0, 0, 0, 1, 1, 2], [0], [0]>} : vector<1x8x8xf32>, vector<1x8x128xf32>, vector<1x8x128xf32> -> vector<1x8x128xf32>
    "tpu.trace_stop"() : () -> ()
    %35 = arith.addf %33, %34 : vector<1x8x128xf32>
    %c0_26 = arith.constant 0 : index
    %c0_27 = arith.constant 0 : index
    %c0_28 = arith.constant 0 : index
    %36 = vector.load %arg12[%c0_26, %c0_27, %c0_28] : memref<1x8x128xf32, #tpu.memory_space<vmem>>, vector<1x8x128xf32>
    tpu.vector_store %arg12[%c0_26, %c0_27, %c0_28], %35 {strides = array<i32>} : memref<1x8x128xf32, #tpu.memory_space<vmem>>, vector<1x8x128xf32>,
    %c0_29 = arith.constant 0 : index
    %c0_30 = arith.constant 0 : index
    %c0_31 = arith.constant 0 : index
    %37 = vector.load %arg10[%c0_29, %c0_30, %c0_31] : memref<1x8x1xf32, #tpu.memory_space<vmem>>, vector<1x8x1xf32>
    tpu.vector_store %arg10[%c0_29, %c0_30, %c0_31], %19 {strides = array<i32>} : memref<1x8x1xf32, #tpu.memory_space<vmem>>, vector<1x8x1xf32>,
    %c0_i32_32 = arith.constant 0 : i32
    %38 = arith.cmpi eq, %arg1, %c0_i32_32 : i32
    %39 = arith.extui %38 : i1 to i32
    %c0_i32_33 = arith.constant 0 : i32
    %40 = arith.cmpi ne, %39, %c0_i32_33 : i32
    scf.if %40 {
      %c0_34 = arith.constant 0 : index
      %c0_35 = arith.constant 0 : index
      %c0_36 = arith.constant 0 : index
      %41 = vector.load %arg11[%c0_34, %c0_35, %c0_36] : memref<1x8x1xf32, #tpu.memory_space<vmem>>, vector<1x8x1xf32>
      %42 = tpu.reciprocal %41 {approx = true} : vector<1x8x1xf32> -> vector<1x8x1xf32>
      %43 = arith.mulf %41, %42 : vector<1x8x1xf32>
      %cst_37 = arith.constant 2.000000e+00 : f32
      %44 = vector.broadcast %cst_37 : f32 to vector<1x8x1xf32>
      %45 = arith.subf %44, %43 : vector<1x8x1xf32>
      %46 = arith.mulf %42, %45 : vector<1x8x1xf32>
      %c0_38 = arith.constant 0 : index
      %c0_39 = arith.constant 0 : index
      %c0_40 = arith.constant 0 : index
      %47 = vector.load %arg12[%c0_38, %c0_39, %c0_40] : memref<1x8x128xf32, #tpu.memory_space<vmem>>, vector<1x8x128xf32>
      %48 = vector.broadcast %46 : vector<1x8x1xf32> to vector<1x8x128xf32>
      %49 = arith.mulf %47, %48 : vector<1x8x128xf32>
      %c0_41 = arith.constant 0 : index
      %c0_42 = arith.constant 0 : index
      %c0_43 = arith.constant 0 : index
      %50 = vector.load %arg6[%c0_41, %c0_42, %c0_43] : memref<1x8x128xf32, #tpu.memory_space<vmem>>, vector<1x8x128xf32>
      tpu.vector_store %arg6[%c0_41, %c0_42, %c0_43], %49 {strides = array<i32>} : memref<1x8x128xf32, #tpu.memory_space<vmem>>, vector<1x8x128xf32>,
    } else {
    }
    return
  }
  func.func @transform_0(%arg0: i32, %arg1: i32) -> (i32, i32, i32) {
    %c0_i32 = arith.constant 0 : i32
    %c0_i32_0 = arith.constant 0 : i32
    %c0_i32_1 = arith.constant 0 : i32
    return %arg0, %c0_i32, %c0_i32_0 : i32, i32, i32
  }
  func.func @transform_1(%arg0: i32, %arg1: i32) -> (i32, i32) {
    %c0_i32 = arith.constant 0 : i32
    %c0_i32_0 = arith.constant 0 : i32
    %c0_i32_1 = arith.constant 0 : i32
    return %c0_i32, %c0_i32_0 : i32, i32
  }
  func.func @transform_2(%arg0: i32, %arg1: i32) -> (i32, i32) {
    %c0_i32 = arith.constant 0 : i32
    %c0_i32_0 = arith.constant 0 : i32
    %c0_i32_1 = arith.constant 0 : i32
    return %c0_i32, %c0_i32_0 : i32, i32
  }
  func.func @transform_3(%arg0: i32, %arg1: i32) -> (i32, i32, i32) {
    %c0_i32 = arith.constant 0 : i32
    %c0_i32_0 = arith.constant 0 : i32
    return %arg0, %c0_i32, %arg1 : i32, i32, i32
  }
  func.func @transform_4(%arg0: i32, %arg1: i32) -> (i32, i32, i32) {
    %c0_i32 = arith.constant 0 : i32
    %c0_i32_0 = arith.constant 0 : i32
    %c0_i32_1 = arith.constant 0 : i32
    return %arg0, %c0_i32, %c0_i32_0 : i32, i32, i32
  }
}

module attributes {stable_mosaic.version = 11 : i64} {
  func.func @_attention_head_kernel(%arg0: i32, %arg1: i32, %arg2: memref<1x8x32xf32, #tpu.memory_space<vmem>>, %arg3: memref<32x384xf32, #tpu.memory_space<vmem>>, %arg4: memref<1x384xf32, #tpu.memory_space<vmem>>, %arg5: memref<1x8x8xi8, #tpu.memory_space<vmem>>, %arg6: memref<1x8x128xf32, #tpu.memory_space<vmem>>, %arg7: memref<1x8x128xf32, #tpu.memory_space<vmem>>, %arg8: memref<1x8x128xf32, #tpu.memory_space<vmem>>, %arg9: memref<1x8x128xf32, #tpu.memory_space<vmem>>, %arg10: memref<1x8x1xf32, #tpu.memory_space<vmem>>, %arg11: memref<1x8x1xf32, #tpu.memory_space<vmem>>, %arg12: memref<1x8x128xf32, #tpu.memory_space<vmem>>) attributes {dimension_semantics = [#tpu.dimension_semantics<parallel>, #tpu.dimension_semantics<arbitrary>], iteration_bounds = array<i64: 2, 1>, scalar_prefetch = 0 : i64, scratch_operands = 6 : i64, tpu.core_type = #tpu.core_type<tc>, window_params = [{transform_indices = @transform_0, window_bounds = array<i64: 1, 8, 32>}, {pipeline_mode = #tpu.pipeline_mode<synchronous>, transform_indices = @transform_1, window_bounds = array<i64: 32, 384>}, {pipeline_mode = #tpu.pipeline_mode<synchronous>, transform_indices = @transform_2, window_bounds = array<i64: 1, 384>}, {transform_indices = @transform_3, window_bounds = array<i64: 1, 8, 8>}, {transform_indices = @transform_4, window_bounds = array<i64: 1, 8, 128>}]} {
    %c0_i32 = arith.constant 0 : i32
    %0 = arith.cmpi eq, %arg1, %c0_i32 : i32
    %1 = arith.extui %0 : i1 to i32
    %c0_i32_0 = arith.constant 0 : i32
    %2 = arith.cmpi ne, %1, %c0_i32_0 : i32
    scf.if %2 {
      %c0_34 = arith.constant 0 : index
      %c0_35 = arith.constant 0 : index
      %c0_36 = arith.constant 0 : index
      %41 = vector.load %arg2[%c0_34, %c0_35, %c0_36] : memref<1x8x32xf32, #tpu.memory_space<vmem>>, vector<1x8x32xf32>
      %42 = vector.shape_cast %41 : vector<1x8x32xf32> to vector<8x32xf32>
      %c0_37 = arith.constant 0 : index
      %c0_38 = arith.constant 0 : index
      %43 = vector.load %arg3[%c0_37, %c0_38] : memref<32x384xf32, #tpu.memory_space<vmem>>, vector<32x384xf32>
      %cst_39 = arith.constant dense<0.000000e+00> : vector<8x384xf32>
      %44 = tpu.matmul %42, %43, %cst_39 {dimension_numbers = #tpu.dot_dimension_numbers<[1], [0], [0], [1], [0, 0, 1, 1], [], []>} : vector<8x32xf32>, vector<32x384xf32>, vector<8x384xf32> -> vector<8x384xf32>
      %c0_40 = arith.constant 0 : index
      %c0_41 = arith.constant 0 : index
      %45 = vector.load %arg4[%c0_40, %c0_41] : memref<1x384xf32, #tpu.memory_space<vmem>>, vector<1x384xf32>
      %46 = vector.broadcast %45 : vector<1x384xf32> to vector<8x384xf32>
      %47 = arith.addf %44, %46 : vector<8x384xf32>
      %48 = vector.shape_cast %47 : vector<8x384xf32> to vector<1x8x384xf32>
      %49 = vector.extract_strided_slice %48 {offsets = [0, 0, 0], sizes = [1, 8, 128], strides = [1, 1, 1]} : vector<1x8x384xf32> to vector<1x8x128xf32>
      %c0_42 = arith.constant 0 : index
      %c0_43 = arith.constant 0 : index
      %c0_44 = arith.constant 0 : index
      %50 = vector.load %arg7[%c0_42, %c0_43, %c0_44] : memref<1x8x128xf32, #tpu.memory_space<vmem>>, vector<1x8x128xf32>
      tpu.vector_store %arg7[%c0_42, %c0_43, %c0_44], %49 {strides = array<i32>} : memref<1x8x128xf32, #tpu.memory_space<vmem>>, vector<1x8x128xf32>,
      %51 = vector.extract_strided_slice %48 {offsets = [0, 0, 128], sizes = [1, 8, 128], strides = [1, 1, 1]} : vector<1x8x384xf32> to vector<1x8x128xf32>
      %c0_45 = arith.constant 0 : index
      %c0_46 = arith.constant 0 : index
      %c0_47 = arith.constant 0 : index
      %52 = vector.load %arg8[%c0_45, %c0_46, %c0_47] : memref<1x8x128xf32, #tpu.memory_space<vmem>>, vector<1x8x128xf32>
      tpu.vector_store %arg8[%c0_45, %c0_46, %c0_47], %51 {strides = array<i32>} : memref<1x8x128xf32, #tpu.memory_space<vmem>>, vector<1x8x128xf32>,
      %53 = vector.extract_strided_slice %48 {offsets = [0, 0, 256], sizes = [1, 8, 128], strides = [1, 1, 1]} : vector<1x8x384xf32> to vector<1x8x128xf32>
      %c0_48 = arith.constant 0 : index
      %c0_49 = arith.constant 0 : index
      %c0_50 = arith.constant 0 : index
      %54 = vector.load %arg9[%c0_48, %c0_49, %c0_50] : memref<1x8x128xf32, #tpu.memory_space<vmem>>, vector<1x8x128xf32>
      tpu.vector_store %arg9[%c0_48, %c0_49, %c0_50], %53 {strides = array<i32>} : memref<1x8x128xf32, #tpu.memory_space<vmem>>, vector<1x8x128xf32>,
      %cst_51 = arith.constant 0xFF800000 : f32
      %55 = vector.broadcast %cst_51 : f32 to vector<1x8x1xf32>
      %c0_52 = arith.constant 0 : index
      %c0_53 = arith.constant 0 : index
      %c0_54 = arith.constant 0 : index
      %56 = vector.load %arg10[%c0_52, %c0_53, %c0_54] : memref<1x8x1xf32, #tpu.memory_space<vmem>>, vector<1x8x1xf32>
      tpu.vector_store %arg10[%c0_52, %c0_53, %c0_54], %55 {strides = array<i32>} : memref<1x8x1xf32, #tpu.memory_space<vmem>>, vector<1x8x1xf32>,
      %cst_55 = arith.constant 0.000000e+00 : f32
      %57 = vector.broadcast %cst_55 : f32 to vector<1x8x1xf32>
      %c0_56 = arith.constant 0 : index
      %c0_57 = arith.constant 0 : index
      %c0_58 = arith.constant 0 : index
      %58 = vector.load %arg11[%c0_56, %c0_57, %c0_58] : memref<1x8x1xf32, #tpu.memory_space<vmem>>, vector<1x8x1xf32>
      tpu.vector_store %arg11[%c0_56, %c0_57, %c0_58], %57 {strides = array<i32>} : memref<1x8x1xf32, #tpu.memory_space<vmem>>, vector<1x8x1xf32>,
      %cst_59 = arith.constant 0.000000e+00 : f32
      %59 = vector.broadcast %cst_59 : f32 to vector<1x8x128xf32>
      %c0_60 = arith.constant 0 : index
      %c0_61 = arith.constant 0 : index
      %c0_62 = arith.constant 0 : index
      %60 = vector.load %arg12[%c0_60, %c0_61, %c0_62] : memref<1x8x128xf32, #tpu.memory_space<vmem>>, vector<1x8x128xf32>
      tpu.vector_store %arg12[%c0_60, %c0_61, %c0_62], %59 {strides = array<i32>} : memref<1x8x128xf32, #tpu.memory_space<vmem>>, vector<1x8x128xf32>,
    } else {
    }
    %c8_i32 = arith.constant 8 : i32
    %3 = arith.muli %arg1, %c8_i32 : i32
    %4 = tpu.assume_multiple %3, 8 : i32
    %c0 = arith.constant 0 : index
    %c0_1 = arith.constant 0 : index
    %c0_2 = arith.constant 0 : index
    %5 = vector.load %arg7[%c0, %c0_1, %c0_2] : memref<1x8x128xf32, #tpu.memory_space<vmem>>, vector<1x8x128xf32>
    %c0_3 = arith.constant 0 : index
    %6 = arith.index_cast %4 : i32 to index
    %c0_4 = arith.constant 0 : index
    %7 = vector.load %arg8[%c0_3, %6, %c0_4] : memref<1x8x128xf32, #tpu.memory_space<vmem>>, vector<1x8x128xf32>
    %c0_5 = arith.constant 0 : index
    %8 = arith.index_cast %4 : i32 to index
    %c0_6 = arith.constant 0 : index
    %9 = vector.load %arg9[%c0_5, %8, %c0_6] : memref<1x8x128xf32, #tpu.memory_space<vmem>>, vector<1x8x128xf32>
    "tpu.trace_start"() <{level = 10 : i32, message = "bqd,bkd->bqk"}> : () -> ()
    %cst = arith.constant dense<0.000000e+00> : vector<1x8x8xf32>
    %10 = tpu.matmul %5, %7, %cst {dimension_numbers = #tpu.dot_dimension_numbers<[2], [2], [1], [1], [0, 0, 0, 1, 1, 1], [0], [0]>} : vector<1x8x128xf32>, vector<1x8x128xf32>, vector<1x8x8xf32> -> vector<1x8x8xf32>
    "tpu.trace_stop"() : () -> ()
    %c0_7 = arith.constant 0 : index
    %c0_8 = arith.constant 0 : index
    %c0_9 = arith.constant 0 : index
    %11 = vector.load %arg5[%c0_7, %c0_8, %c0_9] : memref<1x8x8xi8, #tpu.memory_space<vmem>>, vector<1x8x8xi8>
    %c0_i8 = arith.constant 0 : i8
    %12 = vector.broadcast %c0_i8 : i8 to vector<1x8x8xi8>
    %13 = arith.cmpi ne, %11, %12 : vector<1x8x8xi8>
    %cst_10 = arith.constant -1.000000e+09 : f32
    %14 = vector.broadcast %cst_10 : f32 to vector<1x8x8xf32>
    %15 = arith.select %13, %14, %10 : vector<1x8x8xi1>, vector<1x8x8xf32>
    %c0_11 = arith.constant 0 : index
    %c0_12 = arith.constant 0 : index
    %c0_13 = arith.constant 0 : index
    %16 = vector.load %arg10[%c0_11, %c0_12, %c0_13] : memref<1x8x1xf32, #tpu.memory_space<vmem>>, vector<1x8x1xf32>
    %cst_14 = arith.constant dense<0xFF800000> : vector<1x8xf32>
    %17 = vector.multi_reduction <maximumf>, %15, %cst_14 [2] : vector<1x8x8xf32> to vector<1x8xf32>
    %18 = vector.shape_cast %17 : vector<1x8xf32> to vector<1x8x1xf32>
    %19 = arith.maximumf %16, %18 : vector<1x8x1xf32>
    %20 = arith.subf %16, %19 : vector<1x8x1xf32>
    %21 = math.exp %20 : vector<1x8x1xf32>
    %22 = vector.broadcast %19 : vector<1x8x1xf32> to vector<1x8x8xf32>
    %23 = arith.subf %15, %22 : vector<1x8x8xf32>
    %24 = math.exp %23 : vector<1x8x8xf32>
    %c0_15 = arith.constant 0 : index
    %c0_16 = arith.constant 0 : index
    %c0_17 = arith.constant 0 : index
    %25 = vector.load %arg11[%c0_15, %c0_16, %c0_17] : memref<1x8x1xf32, #tpu.memory_space<vmem>>, vector<1x8x1xf32>
    %26 = arith.mulf %21, %25 : vector<1x8x1xf32>
    %cst_18 = arith.constant dense<0.000000e+00> : vector<1x8xf32>
    %27 = vector.multi_reduction <add>, %24, %cst_18 [2] : vector<1x8x8xf32> to vector<1x8xf32>
    %28 = vector.shape_cast %27 : vector<1x8xf32> to vector<1x8x1xf32>
    %29 = arith.addf %26, %28 : vector<1x8x1xf32>
    %c0_19 = arith.constant 0 : index
    %c0_20 = arith.constant 0 : index
    %c0_21 = arith.constant 0 : index
    %30 = vector.load %arg11[%c0_19, %c0_20, %c0_21] : memref<1x8x1xf32, #tpu.memory_space<vmem>>, vector<1x8x1xf32>
    tpu.vector_store %arg11[%c0_19, %c0_20, %c0_21], %29 {strides = array<i32>} : memref<1x8x1xf32, #tpu.memory_space<vmem>>, vector<1x8x1xf32>,
    %c0_22 = arith.constant 0 : index
    %c0_23 = arith.constant 0 : index
    %c0_24 = arith.constant 0 : index
    %31 = vector.load %arg12[%c0_22, %c0_23, %c0_24] : memref<1x8x128xf32, #tpu.memory_space<vmem>>, vector<1x8x128xf32>
    %32 = vector.broadcast %21 : vector<1x8x1xf32> to vector<1x8x128xf32>
    %33 = arith.mulf %32, %31 : vector<1x8x128xf32>
    "tpu.trace_start"() <{level = 10 : i32, message = "bqk,bkd->bqd"}> : () -> ()
    %cst_25 = arith.constant dense<0.000000e+00> : vector<1x8x128xf32>
    %34 = tpu.matmul %24, %9, %cst_25 {dimension_numbers = #tpu.dot_dimension_numbers<[2], [1], [1], [2], [0, 0, 0, 1, 1, 2], [0], [0]>} : vector<1x8x8xf32>, vector<1x8x128xf32>, vector<1x8x128xf32> -> vector<1x8x128xf32>
    "tpu.trace_stop"() : () -> ()
    %35 = arith.addf %33, %34 : vector<1x8x128xf32>
    %c0_26 = arith.constant 0 : index
    %c0_27 = arith.constant 0 : index
    %c0_28 = arith.constant 0 : index
    %36 = vector.load %arg12[%c0_26, %c0_27, %c0_28] : memref<1x8x128xf32, #tpu.memory_space<vmem>>, vector<1x8x128xf32>
    tpu.vector_store %arg12[%c0_26, %c0_27, %c0_28], %35 {strides = array<i32>} : memref<1x8x128xf32, #tpu.memory_space<vmem>>, vector<1x8x128xf32>,
    %c0_29 = arith.constant 0 : index
    %c0_30 = arith.constant 0 : index
    %c0_31 = arith.constant 0 : index
    %37 = vector.load %arg10[%c0_29, %c0_30, %c0_31] : memref<1x8x1xf32, #tpu.memory_space<vmem>>, vector<1x8x1xf32>
    tpu.vector_store %arg10[%c0_29, %c0_30, %c0_31], %19 {strides = array<i32>} : memref<1x8x1xf32, #tpu.memory_space<vmem>>, vector<1x8x1xf32>,
    %c0_i32_32 = arith.constant 0 : i32
    %38 = arith.cmpi eq, %arg1, %c0_i32_32 : i32
    %39 = arith.extui %38 : i1 to i32
    %c0_i32_33 = arith.constant 0 : i32
    %40 = arith.cmpi ne, %39, %c0_i32_33 : i32
    scf.if %40 {
      %c0_34 = arith.constant 0 : index
      %c0_35 = arith.constant 0 : index
      %c0_36 = arith.constant 0 : index
      %41 = vector.load %arg11[%c0_34, %c0_35, %c0_36] : memref<1x8x1xf32, #tpu.memory_space<vmem>>, vector<1x8x1xf32>
      %42 = tpu.reciprocal %41 {approx = true} : vector<1x8x1xf32> -> vector<1x8x1xf32>
      %43 = arith.mulf %41, %42 : vector<1x8x1xf32>
      %cst_37 = arith.constant 2.000000e+00 : f32
      %44 = vector.broadcast %cst_37 : f32 to vector<1x8x1xf32>
      %45 = arith.subf %44, %43 : vector<1x8x1xf32>
      %46 = arith.mulf %42, %45 : vector<1x8x1xf32>
      %c0_38 = arith.constant 0 : index
      %c0_39 = arith.constant 0 : index
      %c0_40 = arith.constant 0 : index
      %47 = vector.load %arg12[%c0_38, %c0_39, %c0_40] : memref<1x8x128xf32, #tpu.memory_space<vmem>>, vector<1x8x128xf32>
      %48 = vector.broadcast %46 : vector<1x8x1xf32> to vector<1x8x128xf32>
      %49 = arith.mulf %47, %48 : vector<1x8x128xf32>
      %c0_41 = arith.constant 0 : index
      %c0_42 = arith.constant 0 : index
      %c0_43 = arith.constant 0 : index
      %50 = vector.load %arg6[%c0_41, %c0_42, %c0_43] : memref<1x8x128xf32, #tpu.memory_space<vmem>>, vector<1x8x128xf32>
      tpu.vector_store %arg6[%c0_41, %c0_42, %c0_43], %49 {strides = array<i32>} : memref<1x8x128xf32, #tpu.memory_space<vmem>>, vector<1x8x128xf32>,
    } else {
    }
    return
  }
  func.func @transform_0(%arg0: i32, %arg1: i32) -> (i32, i32, i32) {
    %c0_i32 = arith.constant 0 : i32
    %c0_i32_0 = arith.constant 0 : i32
    %c0_i32_1 = arith.constant 0 : i32
    return %arg0, %c0_i32, %c0_i32_0 : i32, i32, i32
  }
  func.func @transform_1(%arg0: i32, %arg1: i32) -> (i32, i32) {
    %c0_i32 = arith.constant 0 : i32
    %c0_i32_0 = arith.constant 0 : i32
    %c0_i32_1 = arith.constant 0 : i32
    return %c0_i32, %c0_i32_0 : i32, i32
  }
  func.func @transform_2(%arg0: i32, %arg1: i32) -> (i32, i32) {
    %c0_i32 = arith.constant 0 : i32
    %c0_i32_0 = arith.constant 0 : i32
    %c0_i32_1 = arith.constant 0 : i32
    return %c0_i32, %c0_i32_0 : i32, i32
  }
  func.func @transform_3(%arg0: i32, %arg1: i32) -> (i32, i32, i32) {
    %c0_i32 = arith.constant 0 : i32
    %c0_i32_0 = arith.constant 0 : i32
    return %arg0, %c0_i32, %arg1 : i32, i32, i32
  }
  func.func @transform_4(%arg0: i32, %arg1: i32) -> (i32, i32, i32) {
    %c0_i32 = arith.constant 0 : i32
    %c0_i32_0 = arith.constant 0 : i32
    %c0_i32_1 = arith.constant 0 : i32
    return %arg0, %c0_i32, %c0_i32_0 : i32, i32, i32
  }
}

</mosaic_0001>

<bundles_post_ra>
// kernel: tpu_custom_call.1
= control target key start
LH: loop header
LB: loop body
LE: loop exit
PB: predicated region body
PF: predicated region fallthrough
CT: control target
= control target key end

     0   :  { %s1192_s0 = inlined_call_operand.hbm [shape: f32[2,8,32], index: 0, kind: input, shape index: {}]   ;;  %s1193_s1 = inlined_call_operand.hbm [shape: f32[32,384], index: 1, kind: input, shape index: {}]   ;;  %s1194_s2 = inlined_call_operand.hbm [shape: f32[1,384], index: 2, kind: input, shape index: {}]   ;;  %s1195_s3 = inlined_call_operand.hbm [shape: s8[2,8,8], index: 3, kind: input, shape index: {}]   ;;  %s1196_s4 = inlined_call_operand.hbm [shape: f32[2,8,128], index: 4, kind: output, shape index: {}]  }
   0x1   :  { %1201 = sst [smem:[#allocation25_spill]] %s1193_s1 }
   0x2   :  { %1202 = sst [smem:[#allocation26_spill]] %s1194_s2 }
   0x3   :  { %9 = vsyncpa [#allocation9], 0 }
   0x4   :  { %11 = vsyncpa [#allocation9 + $0x1], 0 }
   0x5   :  { %12 = vsyncpa [#allocation12], 0 }
   0x6   :  { %13 = vsyncpa [#allocation15], 0 }
   0x7   :  { %15 = vsyncpa [#allocation15 + $0x1], 0 }
   0x8   :  { %16 = vsyncpa [#allocation10], 0 }
   0x9   :  { %18 = vsyncpa [#allocation10 + $0x1], 0  ;;  %s1015_s15 = smov 0   ;;  %s1017_s16 = smov 0  }
   0xa   :  { %s1019_s17 = smov 0   ;;  %s1021_s18 = smov 0  }
   0xb   :  { %s1023_s19 = smov 0   ;;  %s1025_s20 = smov 0  }
   0xc LB: > { %1203 = sst [smem:[#allocation21_spill]] %s969_s17  ;;  %s645_s21 = sadd.s32 4294967295, %s981_s20   ;;  %s981_s20 = sphi %s1025_s20, %s24_s20   ;;  %s977_s19 = sphi %s1023_s19, %s1222_s19   ;;  %s973_s18 = sphi %s1021_s18, %s1221_s18   ;;  %s969_s17 = sphi %s1019_s17, %s1217_s17   ;;  %s965_s16 = sphi %s1017_s16, %s1220_s16   ;;  %s961_s15 = sphi %s1015_s15, %s1219_s15  }
   0xd   : > { %1204 = sst [smem:[#allocation22_spill]] %s981_s20  ;;  %p647_p0 = scmp.ge.s32.totalorder %s981_s20, 1 }
   0xe   : > { %p1049_p1 = scmp.eq.s32.totalorder %s645_s21, 0  ;;  %p163_p2 = scmp.lt.s32.totalorder %s981_s20, 3 }
   0xf   : > { %s1206_s1 = sld [smem:[#allocation25_spill]]  ;;  %s983_s27 = smov [#allocation11]  }
  0x10   : > { %p1057_p3 = pnand %p647_p0, %p163_p2  ;;  %s176_s28 = sshll.u32 %s983_s27, 4  ;;  %s177_s28 = int_to_ptr.vmem [resolvable:$true] %s176_s28 }
  0x11   : > { %p650_p6 = scmp.ge.s32.totalorder %s981_s20, 2  ;;  %s1208_s2 = sld [smem:[#allocation26_spill]] }
  0x12   : > { %p683_p4 = pneg %p1057_p3  ;;  %s984_s6 = smov 384  }
  0x13   : > { %s985_s7 = smov 24   ;;  %s986_s8 = smov [#allocation13]  }
  0x14   : > { %p684_p5 = pnand %p683_p4, %p1049_p1  ;;  %s191_s9 = sshll.u32 %s986_s8, 4  ;;  %s192_s9 = int_to_ptr.vmem [resolvable:$true] %s191_s9 }
  0x15   : > { %s174_s25 = sshll.u32 %s1206_s1, 4  ;;  %s646_s10 = sadd.s32 4294967294, %s981_s20   ;;  %s175_s25 = int_to_ptr.hbm [resolvable:$true] %s174_s25 }
  0x16   : > { %686 = dma.hbm_to_vmem [thread:$0]  (!%p684_p5), %s175_s25, 1536, %s177_s28, [#allocation12], %s984_s6, %s984_s6, %s985_s7  }
  0x17   : > { %s189_s5 = sshll.u32 %s1208_s2, 4  ;;  %s36_s11 = sadd.s32 1, %s977_s19  ;;  %s190_s5 = int_to_ptr.hbm [resolvable:$true] %s189_s5 }
  0x18   : > { %689 = dma.hbm_to_vmem [thread:$0]  (!%p684_p5), %s190_s5, 48, %s192_s9, [#allocation12]  }
  0x19   : > { %p38_p7 = scmp.ge.s32.totalorder %s36_s11, 2  ;;  %s43_s12 = sadd.s32 1, %s969_s17 }
  0x1a   : > { %p50_p8 = scmp.ne.s32.totalorder %s969_s17, %s965_s16  ;;  %p51_p9 = scmp.eq.s32.totalorder %s981_s20, 0 }
  0x1b   : > { %s1224_s11 = smov (%p38_p7, %s36_s11), 0  ;;  %p56_p11 = scmp.ne.s32.totalorder %s965_s16, %s961_s15 }
  0x1c   : > { %1209 = sst [smem:[#allocation23_spill]] %s1224_s11  ;;  %p1077_p10 = por %p51_p9, %p50_p8 }
  0x1d   : > { %s40_s14 = ssub.s32 %s977_s19, %s1224_s11  ;;  %p150_p12 = scmp.eq.s32.totalorder %s645_s21, 1 }
  0x1e   : > { %p41_p13 = scmp.eq.s32.totalorder %s40_s14, 0  ;;  %p1089_p0 = por %p1049_p1, %p56_p11 }
  0x1f   : > { %p1093_p2 = por %p150_p12, %p50_p8  ;;  %p156_p4 = scmp.eq.s32.totalorder %s646_s10, 1 }
  0x20   : > { %s1098_s25 = scalar_select %p41_p13, %s969_s17, %s43_s12  }
  0x21   : > { %p1100_p5 = por %p156_p4, %p56_p11  ;;  %p703_p7 = scmp.lt.s32.totalorder %s981_s20, 2 }
  0x22   : > { %1213 = sst [smem:[#allocation24_spill]] %s1098_s25  ;;  %s202_s21 = sand.u32 1, %s969_s17  }
  0x23   : > { %s652_s28 = sshll.u32 %s977_s19, 3  ;;  %s651_s29 = sshll.u32 %s202_s21, 3 }
  0x24   : > { %s210_s6 = scalar_lea.hbm %s1192_s0, %s652_s28  ;;  %s206_s8 = scalar_lea.vmem [#allocation8], %s651_s29 }
  0x25   : > { %s212_s7 = sshll.u32 %s210_s6, 4  ;;  %s214_s9 = sshll.u32 %s206_s8, 4  ;;  %s213_s7 = int_to_ptr.hbm [resolvable:$true] %s212_s7  ;;  %s215_s9 = int_to_ptr.vmem [resolvable:$true] %s214_s9 }
  0x26   : > { %p691_p8 = pnand %p703_p7, %p1077_p10  ;;  %s653_s10 = sshll.u32 %s202_s21, 1 }
  0x27   : > { %s654_s12 = sshll.u32 %s977_s19, 1  ;;  %s203_s14 = scalar_lea.sflag [#allocation9], %s202_s21 }
  0x28   : > { %693 = dma.hbm_to_vmem [thread:$0]  (!%p691_p8), %s213_s7, 128, %s215_s9, %s203_s14  }
  0x29   : > { %s230_s11 = scalar_lea.hbm %s1195_s3, %s654_s12  ;;  %s225_s25 = scalar_lea.vmem [#allocation14], %s653_s10 }
  0x2a   : > { %s234_s17 = sshll.u32 %s225_s25, 4  ;;  %s232_s20 = sshll.u32 %s230_s11, 4  ;;  %s235_s17 = int_to_ptr.vmem [resolvable:$true] %s234_s17  ;;  %s233_s20 = int_to_ptr.hbm [resolvable:$true] %s232_s20 }
  0x2b   : > { %s222_s28 = scalar_lea.sflag [#allocation15], %s202_s21  ;;  %243 = sbr.rel (%p1057_p3) target bundleno = 807 (0x327), region = 36 }
  0x2c   : > { %696 = dma.hbm_to_vmem [thread:$0]  (!%p691_p8), %s233_s20, 32, %s235_s17, %s222_s28  }
  0x2d   : > { %s1119_s13 = sand.u32 (!%p1057_p3), 1, %s965_s16  }
  0x2e   : > { %s656_s29 = sshll.u32 (!%p1057_p3), %s1119_s13, 3  ;;  %s246_s1 = scalar_lea.sflag (!%p1057_p3), [#allocation9], %s1119_s13 }
  0x2f   : > { %s249_s2 = scalar_lea.vmem (!%p1057_p3), [#allocation8], %s656_s29 }
  0x30   : > { %944 = dma.done.wait (%p1089_p0), %s246_s1, 128  }
  0x31   : > { %946 = vsyncadd (%p1089_p0), %s246_s1, 4294967168 }
  0x32   : > { %948 = dma.done.wait (%p1049_p1), [#allocation12], 1584  }
  0x33   : > { %950 = vsyncadd (%p1049_p1), [#allocation12], 4294965712  ;;  %s659_s17 = sshll.u32 %s1119_s13, 1  ;;  %s266_s20 = scalar_lea.sflag [#allocation15], %s1119_s13 }
  0x34   : > { %s1135_s26 = scalar_lea.vmem [#allocation14], %s659_s17 }
  0x35   : > { %952 = dma.done.wait (%p1089_p0), %s266_s20, 32  }
  0x36   : > { %954 = vsyncadd (%p1089_p0), %s266_s20, 4294967264  ;;  %v317_v0 = vld [vmem:[#allocation11 + $0x50] sm:$0xff]  ;;  %v314_v1 = vld [vmem:[#allocation11 + $0x38] sm:$0xff]  ;;  %vm327_vm0 = vcmask 261120   ;;  %v987_v16 = vmov 0   ;;  %vm394_vm1 = vcmask 7168  }
  0x37   : > { %v316_v2 = vld [vmem:[#allocation11 + $0x48] sm:$0xff]  ;;  %363 = vmatpush.msra.mxu1 %v317_v0  ;;  %v313_v3 = vld [vmem:[#allocation11 + $0x30] sm:$0xff]  ;;  %v311_v4 = vld [vmem:[#allocation11 + $0x20] sm:$0xff]  ;;  %762 = vset.pattern.permute.xlu0 %v987_v16  ;;  %v988_v19 = vmov -inf   ;;  %vm431_vm4 = vcmask 64512   ;;  %v989_v28 = vmov 0.0  }
  0x38   : > { %343 = vmatpush.msra.mxu0 %v316_v2  ;;  %v310_v5 = vld [vmem:[#allocation11 + $0x18] sm:$0xff]  ;;  %v308_v6 = vld [vmem:[#allocation11 + $0x8] sm:$0xff]  ;;  %v307_v7 = vld [vmem:[#allocation11] sm:$0xff]  ;;  %763 = vset.pattern.permute.xlu1 %v987_v16  ;;  %395 = vst.msk [vmem:[#allocation5] sm:$0xff] %vm394_vm1, %v988_v19  ;;  %s666_s22 = sshll.u32 %s973_s18, 3  ;;  %s299_s21 = scalar_lea.vmem [#allocation16], %s656_s29 }
  0x39   : > { %364 = vmatpush.msra.mxu1 %v314_v1  ;;  %v306_v8 = vld [vmem:[%s249_s2] sm:$0xff]  ;;  %v319_v9 = vld [vmem:[#allocation13] sm:$0x7]  ;;  %764 = vset.pattern.permute.xlu2 %v987_v16  ;;  %v312_v20 = vld [vmem:[#allocation11 + $0x28] sm:$0xff]  ;;  %396 = vst.msk [vmem:[#allocation6] sm:$0xff] %vm394_vm1, %v989_v28  ;;  %s515_s25 = scalar_lea.hbm %s1196_s4, %s666_s22  ;;  %s517_s30 = sshll.u32 %s299_s21, 4  ;;  %s518_s30 = int_to_ptr.vmem [resolvable:$true] %s517_s30 }
  0x3a   : > { %344 = vmatpush.msra.mxu0 %v313_v3  ;;  %v322_v10 = vperm.slane %v319_v9, 1  ;;  %v321_v11 = vperm.slane %v319_v9, 0  ;;  %v318_v17 = vld [vmem:[#allocation11 + $0x58] sm:$0xff]  ;;  %v315_v18 = vld [vmem:[#allocation11 + $0x40] sm:$0xff]  ;;  %v309_v21 = vld [vmem:[#allocation11 + $0x10] sm:$0xff]  ;;  %v323_v33 = vperm.slane %v319_v9, 2 }
  0x3b   : > { %365 = vmatpush.msra.mxu1 %v311_v4  ;;  %383 = vmatpush.msra.mxu2 %v318_v17  ;;  %v424_v22 = vld [vmem:[%s1135_s26] sm:$0x3]  ;;  %s519_s5 = sshll.u32 %s515_s25, 4  ;;  %s505_s6 = scalar_lea.sflag [#allocation10], %s1119_s13  ;;  %s520_s5 = int_to_ptr.hbm [resolvable:$true] %s519_s5 }
  0x3c   : > { %345 = vmatpush.msra.mxu0 %v310_v5  ;;  %vm425_vm2 = vnez %v424_v22  ;;  %s905_s7 = sshra.s32 %s520_s5, 4  ;;  %s911_s10 = scalar_lea.hbm %s1196_s4, 16  ;;  %s906_s7 = int_to_ptr.hbm [resolvable:$true] %s905_s7 }
  0x3d   : > { %366 = vmatpush.msra.mxu1 %v308_v6  ;;  %384 = vmatpush.msra.mxu2 %v315_v18  ;;  %v426_v23 = vsel %vm425_vm2, 16843009, %v987_v16  ;;  %s907_s18 = scalar_lea.hbm %s906_s7, 8  ;;  %p912_p10 = scmp.lt.s32.totalorder %s906_s7, %s1196_s4 }
  0x3e   : > { %346 = vmatpush.msra.mxu0 %v307_v7  ;;  %662 = vmatmul.msk.f32.vlgmr.msra.gmra.mxu1 %vm327_vm0, %v306_v8  ;;  %v427_v24 = vunpack.c.0.s8 %v426_v23  ;;  %p908_p1 = scmp.ne.s32.totalorder %s906_s7, %s907_s18  ;;  %p913_p11 = scmp.lt.s32.totalorder %s911_s10, %s907_s18 }
  0x3f   : > { %661 = vmatmul.msk.f32.vlgmr.msra.gmra.mxu0 %vm327_vm0, %v306_v8  ;;  %385 = vmatpush.msra.mxu2 %v312_v20  ;;  %v430_v29 = vld [vmem:[#allocation5] sm:$0xff] }
  0x40   : > { %vm428_vm3 = vcmp.ne.s32.totalorder %v427_v24, 0  ;;  %v447_v43 = vld [vmem:[#allocation6] sm:$0xff]  ;;  %p909_p3 = pnand %p908_p1, %p1093_p2  ;;  %p914_p12 = por %p913_p11, %p912_p10 }
  0x41   : > { %386 = vmatpush.msra.mxu2 %v309_v21 }
  0x42   : > { %663 = vmatmul.msk.f32.vlgmr.msra.gmra.mxu2 %vm327_vm0, %v306_v8  ;;  %p910_p9 = pneg %p909_p3 }
  0x44   : > { %p915_p13 = pnand %p914_p12, %p910_p9 }
  0xbb   : > { %v368_v12 = vpop.f32.mrf.mxu1 }
  0xbc   : > { %v348_v13 = vpop.f32.mrf.mxu0  ;;  %v369_v14 = vadd.f32 %v368_v12, %v322_v10 }
  0xbd   : > { %v349_v15 = vadd.f32 %v348_v13, %v321_v11 }
  0xbe   : > { %419 = vmatpush.xpose.msra.mxu3 %v369_v14 }
  0xc1   : > { %420 = vmatmul.f32.vlgmr.msra.gmra.mxu3 %v349_v15 }
  0xc5   : > { %v388_v34 = vpop.f32.mrf.mxu2 }
  0xc6   : > { %v389_v35 = vadd.f32 %v388_v34, %v323_v33 }
  0xc8   : > { %480 = vmatpush.msrb.mxu3 %v389_v35 }
 0x144   : > { %v421_v25 = vpop.f32.mrf.mxu3 }
 0x145   : > { %v429_v26 = vsel %vm428_vm3, -1e+09, %v421_v25 }
 0x146   : > { %v432_v27 = vsel %vm431_vm4, %v429_v26, -inf }
 0x147   : > { %433 = vmax.xlane.f32.xlu0 %v432_v27 }
 0x1ba   : > { %v434_v30 = vpop.xlane.xlu0 %433 }
 0x1bb   : > { %v435_v31 = vmax.f32 %v430_v29, %v434_v30 }
 0x1bd   : > { %v436_v32 = vsub.f32 %v430_v29, %v435_v31  ;;  %487 = vst.msk [vmem:[#allocation5] sm:$0xff] %vm394_vm1, %v435_v31  ;;  %441 = vperm.xlu0 %762, %v435_v31  }
 0x1bf   : > { %v437_v41 = vmul.f32 1.442695, %v436_v32 }
 0x22f   : > { %v442_v36 = vpop.permute.xlu0 %441 }
 0x230   : > { %v444_v37 = vsub.f32 %v429_v26, %v442_v36 }
 0x232   : > { %v445_v38 = vmul.f32 1.442695, %v444_v37 }
 0x234   : > { %765 = vpow2.f32 %v445_v38 }
 0x235   : > { %767 = vpow2.f32 %v437_v41 }
 0x23a   : > { %v766_v39 = vpop.eup %765 }
 0x23b   : > { %664 = vmatmul.msk.f32.vlgmr.msrb.gmra.mxu3 %vm431_vm4, %v766_v39  ;;  %v449_v40 = vsel %vm431_vm4, %v766_v39, 0.0  ;;  %v768_v42 = vpop.eup %767 }
 0x23c   : > { %450 = vadd.xlane.f32.xlu1 %v449_v40  ;;  %v448_v44 = vmul.f32 %v768_v42, %v447_v43 }
 0x255   : > { %458 = vperm.xlu1 %763, %v768_v42  }
 0x2af   : > { %v451_v45 = vpop.xlane.xlu1 %450 }
 0x2b0   : > { %v452_v46 = vadd.f32 %v451_v45, %v448_v44 }
 0x2b2   : > { %454 = vst.msk [vmem:[#allocation6] sm:$0xff] %vm394_vm1, %v452_v46 }
 0x2b9   : > { %v491_v47 = vld [vmem:[#allocation6] sm:$0xff] }
 0x2ba   : > { %769 = vrcp.f32 %v491_v47 }
 0x2be   : > { %v482_v54 = vpop.f32.mrf.mxu3 }
 0x2c0   : > { %v770_v48 = vpop.eup %769 }
 0x2c1   : > { %v493_v49 = vmul.f32 %v770_v48, %v491_v47 }
 0x2c3   : > { %v494_v50 = vsub.f32 2.0, %v493_v49 }
 0x2c5   : > { %v495_v51 = vmul.f32 %v770_v48, %v494_v50 }
 0x2c7   : > { %499 = vperm.xlu2 %764, %v495_v51   ;;  %v459_v52 = vpop.permute.xlu1 %458 }
 0x2c8   : > { %v461_v53 = vmul.f32 0.0, %v459_v52 }
 0x2ca   : > { %v485_v55 = vadd.f32 %v482_v54, %v461_v53 }
 0x321   : > { %v500_v56 = vpop.permute.xlu2 %499 }
 0x322   : > { %v502_v57 = vmul.f32 %v500_v56, %v485_v55 }
 0x324   : > { %503 = vst [vmem:[%s299_s21] sm:$0xff] %v502_v57 }
 0x325   : > { %918 = shalt.err (!%p915_p13)
}
 0x326   : > { %681 = dma.vmem_to_hbm [thread:$0]  (%p1093_p2), %s518_s30, 128, %s520_s5, %s505_s6  }
 0x327 PF: > { %s1215_s28 = sld [smem:[#allocation22_spill]]  ;;  %s531_s13 = sand.u32 1, %s961_s15  }
 0x328   : > { %p698_p0 = pnand %p650_p6, %p1100_p5  ;;  %s532_s29 = scalar_lea.sflag [#allocation10], %s531_s13 }
 0x32a   : > { %p699_p4 = pneg %p698_p0 }
 0x32c   : > { %956 = dma.done.wait (%p699_p4), %s532_s29, 128  }
 0x32d   : > { %958 = vsyncadd (%p699_p4), %s532_s29, 4294967168  ;;  %s24_s20 = sadd.s32 1, %s1215_s28   ;;  %s1216_s1 = sld [smem:[#allocation21_spill]] }
 0x32e   : > { %p21_p7 = scmp.ge.s32.totalorder %s24_s20, 4   ;;  %s1217_s17 = sld [smem:[#allocation24_spill]] }
 0x32f   : > { %s1218_s24 = sld [smem:[#allocation23_spill]]  ;;  %s1219_s15 = smov %s965_s16 }
 0x330   : > { %s1221_s18 = smov %s977_s19 }
 0x331   :  { %23 = sbr.rel (!%p21_p7) target bundleno = 12 (0xc), region = 112 }
 0x333   : > { %s1220_s16 = smov %s1216_s1 }
 0x335   : > { %s1222_s19 = smov %s1218_s24 }
 0x336   :  { %538 = vsyncpa [#allocation9], 1 }
 0x337   :  { %540 = vsyncpa [#allocation9 + $0x1], 1 }
 0x338   :  { %541 = vsyncpa [#allocation12], 1 }
 0x339   :  { %542 = vsyncpa [#allocation15], 1 }
 0x33a   :  { %544 = vsyncpa [#allocation15 + $0x1], 1 }
 0x33b   :  { %545 = vsyncpa [#allocation10], 1 }
 0x33c   :  { %547 = vsyncpa [#allocation10 + $0x1], 1 }

// kernel: tpu_custom_call.1
= control target key start
LH: loop header
LB: loop body
LE: loop exit
PB: predicated region body
PF: predicated region fallthrough
CT: control target
= control target key end

     0   :  { %s1192_s0 = inlined_call_operand.hbm [shape: f32[2,8,32], index: 0, kind: input, shape index: {}]   ;;  %s1193_s1 = inlined_call_operand.hbm [shape: f32[32,384], index: 1, kind: input, shape index: {}]   ;;  %s1194_s2 = inlined_call_operand.hbm [shape: f32[1,384], index: 2, kind: input, shape index: {}]   ;;  %s1195_s3 = inlined_call_operand.hbm [shape: s8[2,8,8], index: 3, kind: input, shape index: {}]   ;;  %s1196_s4 = inlined_call_operand.hbm [shape: f32[2,8,128], index: 4, kind: output, shape index: {}]  }
   0x1   :  { %1201 = sst [smem:[#allocation25_spill]] %s1193_s1 }
   0x2   :  { %1202 = sst [smem:[#allocation26_spill]] %s1194_s2 }
   0x3   :  { %9 = vsyncpa [#allocation9], 0 }
   0x4   :  { %11 = vsyncpa [#allocation9 + $0x1], 0 }
   0x5   :  { %12 = vsyncpa [#allocation12], 0 }
   0x6   :  { %13 = vsyncpa [#allocation15], 0 }
   0x7   :  { %15 = vsyncpa [#allocation15 + $0x1], 0 }
   0x8   :  { %16 = vsyncpa [#allocation10], 0 }
   0x9   :  { %18 = vsyncpa [#allocation10 + $0x1], 0  ;;  %s1015_s15 = smov 0   ;;  %s1017_s16 = smov 0  }
   0xa   :  { %s1019_s17 = smov 0   ;;  %s1021_s18 = smov 0  }
   0xb   :  { %s1023_s19 = smov 0   ;;  %s1025_s20 = smov 0  }
   0xc LB: > { %1203 = sst [smem:[#allocation21_spill]] %s969_s17  ;;  %s645_s21 = sadd.s32 4294967295, %s981_s20   ;;  %s981_s20 = sphi %s1025_s20, %s24_s20   ;;  %s977_s19 = sphi %s1023_s19, %s1222_s19   ;;  %s973_s18 = sphi %s1021_s18, %s1221_s18   ;;  %s969_s17 = sphi %s1019_s17, %s1217_s17   ;;  %s965_s16 = sphi %s1017_s16, %s1220_s16   ;;  %s961_s15 = sphi %s1015_s15, %s1219_s15  }
   0xd   : > { %1204 = sst [smem:[#allocation22_spill]] %s981_s20  ;;  %p647_p0 = scmp.ge.s32.totalorder %s981_s20, 1 }
   0xe   : > { %p1049_p1 = scmp.eq.s32.totalorder %s645_s21, 0  ;;  %p163_p2 = scmp.lt.s32.totalorder %s981_s20, 3 }
   0xf   : > { %s1206_s1 = sld [smem:[#allocation25_spill]]  ;;  %s983_s27 = smov [#allocation11]  }
  0x10   : > { %p1057_p3 = pnand %p647_p0, %p163_p2  ;;  %s176_s28 = sshll.u32 %s983_s27, 4  ;;  %s177_s28 = int_to_ptr.vmem [resolvable:$true] %s176_s28 }
  0x11   : > { %p650_p6 = scmp.ge.s32.totalorder %s981_s20, 2  ;;  %s1208_s2 = sld [smem:[#allocation26_spill]] }
  0x12   : > { %p683_p4 = pneg %p1057_p3  ;;  %s984_s6 = smov 384  }
  0x13   : > { %s985_s7 = smov 24   ;;  %s986_s8 = smov [#allocation13]  }
  0x14   : > { %p684_p5 = pnand %p683_p4, %p1049_p1  ;;  %s191_s9 = sshll.u32 %s986_s8, 4  ;;  %s192_s9 = int_to_ptr.vmem [resolvable:$true] %s191_s9 }
  0x15   : > { %s174_s25 = sshll.u32 %s1206_s1, 4  ;;  %s646_s10 = sadd.s32 4294967294, %s981_s20   ;;  %s175_s25 = int_to_ptr.hbm [resolvable:$true] %s174_s25 }
  0x16   : > { %686 = dma.hbm_to_vmem [thread:$0]  (!%p684_p5), %s175_s25, 1536, %s177_s28, [#allocation12], %s984_s6, %s984_s6, %s985_s7  }
  0x17   : > { %s189_s5 = sshll.u32 %s1208_s2, 4  ;;  %s36_s11 = sadd.s32 1, %s977_s19  ;;  %s190_s5 = int_to_ptr.hbm [resolvable:$true] %s189_s5 }
  0x18   : > { %689 = dma.hbm_to_vmem [thread:$0]  (!%p684_p5), %s190_s5, 48, %s192_s9, [#allocation12]  }
  0x19   : > { %p38_p7 = scmp.ge.s32.totalorder %s36_s11, 2  ;;  %s43_s12 = sadd.s32 1, %s969_s17 }
  0x1a   : > { %p50_p8 = scmp.ne.s32.totalorder %s969_s17, %s965_s16  ;;  %p51_p9 = scmp.eq.s32.totalorder %s981_s20, 0 }
  0x1b   : > { %s1224_s11 = smov (%p38_p7, %s36_s11), 0  ;;  %p56_p11 = scmp.ne.s32.totalorder %s965_s16, %s961_s15 }
  0x1c   : > { %1209 = sst [smem:[#allocation23_spill]] %s1224_s11  ;;  %p1077_p10 = por %p51_p9, %p50_p8 }
  0x1d   : > { %s40_s14 = ssub.s32 %s977_s19, %s1224_s11  ;;  %p150_p12 = scmp.eq.s32.totalorder %s645_s21, 1 }
  0x1e   : > { %p41_p13 = scmp.eq.s32.totalorder %s40_s14, 0  ;;  %p1089_p0 = por %p1049_p1, %p56_p11 }
  0x1f   : > { %p1093_p2 = por %p150_p12, %p50_p8  ;;  %p156_p4 = scmp.eq.s32.totalorder %s646_s10, 1 }
  0x20   : > { %s1098_s25 = scalar_select %p41_p13, %s969_s17, %s43_s12  }
  0x21   : > { %p1100_p5 = por %p156_p4, %p56_p11  ;;  %p703_p7 = scmp.lt.s32.totalorder %s981_s20, 2 }
  0x22   : > { %1213 = sst [smem:[#allocation24_spill]] %s1098_s25  ;;  %s202_s21 = sand.u32 1, %s969_s17  }
  0x23   : > { %s652_s28 = sshll.u32 %s977_s19, 3  ;;  %s651_s29 = sshll.u32 %s202_s21, 3 }
  0x24   : > { %s210_s6 = scalar_lea.hbm %s1192_s0, %s652_s28  ;;  %s206_s8 = scalar_lea.vmem [#allocation8], %s651_s29 }
  0x25   : > { %s212_s7 = sshll.u32 %s210_s6, 4  ;;  %s214_s9 = sshll.u32 %s206_s8, 4  ;;  %s213_s7 = int_to_ptr.hbm [resolvable:$true] %s212_s7  ;;  %s215_s9 = int_to_ptr.vmem [resolvable:$true] %s214_s9 }
  0x26   : > { %p691_p8 = pnand %p703_p7, %p1077_p10  ;;  %s653_s10 = sshll.u32 %s202_s21, 1 }
  0x27   : > { %s654_s12 = sshll.u32 %s977_s19, 1  ;;  %s203_s14 = scalar_lea.sflag [#allocation9], %s202_s21 }
  0x28   : > { %693 = dma.hbm_to_vmem [thread:$0]  (!%p691_p8), %s213_s7, 128, %s215_s9, %s203_s14  }
  0x29   : > { %s230_s11 = scalar_lea.hbm %s1195_s3, %s654_s12  ;;  %s225_s25 = scalar_lea.vmem [#allocation14], %s653_s10 }
  0x2a   : > { %s234_s17 = sshll.u32 %s225_s25, 4  ;;  %s232_s20 = sshll.u32 %s230_s11, 4  ;;  %s235_s17 = int_to_ptr.vmem [resolvable:$true] %s234_s17  ;;  %s233_s20 = int_to_ptr.hbm [resolvable:$true] %s232_s20 }
  0x2b   : > { %s222_s28 = scalar_lea.sflag [#allocation15], %s202_s21  ;;  %243 = sbr.rel (%p1057_p3) target bundleno = 807 (0x327), region = 36 }
  0x2c   : > { %696 = dma.hbm_to_vmem [thread:$0]  (!%p691_p8), %s233_s20, 32, %s235_s17, %s222_s28  }
  0x2d   : > { %s1119_s13 = sand.u32 (!%p1057_p3), 1, %s965_s16  }
  0x2e   : > { %s656_s29 = sshll.u32 (!%p1057_p3), %s1119_s13, 3  ;;  %s246_s1 = scalar_lea.sflag (!%p1057_p3), [#allocation9], %s1119_s13 }
  0x2f   : > { %s249_s2 = scalar_lea.vmem (!%p1057_p3), [#allocation8], %s656_s29 }
  0x30   : > { %944 = dma.done.wait (%p1089_p0), %s246_s1, 128  }
  0x31   : > { %946 = vsyncadd (%p1089_p0), %s246_s1, 4294967168 }
  0x32   : > { %948 = dma.done.wait (%p1049_p1), [#allocation12], 1584  }
  0x33   : > { %950 = vsyncadd (%p1049_p1), [#allocation12], 4294965712  ;;  %s659_s17 = sshll.u32 %s1119_s13, 1  ;;  %s266_s20 = scalar_lea.sflag [#allocation15], %s1119_s13 }
  0x34   : > { %s1135_s26 = scalar_lea.vmem [#allocation14], %s659_s17 }
  0x35   : > { %952 = dma.done.wait (%p1089_p0), %s266_s20, 32  }
  0x36   : > { %954 = vsyncadd (%p1089_p0), %s266_s20, 4294967264  ;;  %v317_v0 = vld [vmem:[#allocation11 + $0x50] sm:$0xff]  ;;  %v314_v1 = vld [vmem:[#allocation11 + $0x38] sm:$0xff]  ;;  %vm327_vm0 = vcmask 261120   ;;  %v987_v16 = vmov 0   ;;  %vm394_vm1 = vcmask 7168  }
  0x37   : > { %v316_v2 = vld [vmem:[#allocation11 + $0x48] sm:$0xff]  ;;  %363 = vmatpush.msra.mxu1 %v317_v0  ;;  %v313_v3 = vld [vmem:[#allocation11 + $0x30] sm:$0xff]  ;;  %v311_v4 = vld [vmem:[#allocation11 + $0x20] sm:$0xff]  ;;  %762 = vset.pattern.permute.xlu0 %v987_v16  ;;  %v988_v19 = vmov -inf   ;;  %vm431_vm4 = vcmask 64512   ;;  %v989_v28 = vmov 0.0  }
  0x38   : > { %343 = vmatpush.msra.mxu0 %v316_v2  ;;  %v310_v5 = vld [vmem:[#allocation11 + $0x18] sm:$0xff]  ;;  %v308_v6 = vld [vmem:[#allocation11 + $0x8] sm:$0xff]  ;;  %v307_v7 = vld [vmem:[#allocation11] sm:$0xff]  ;;  %763 = vset.pattern.permute.xlu1 %v987_v16  ;;  %395 = vst.msk [vmem:[#allocation5] sm:$0xff] %vm394_vm1, %v988_v19  ;;  %s666_s22 = sshll.u32 %s973_s18, 3  ;;  %s299_s21 = scalar_lea.vmem [#allocation16], %s656_s29 }
  0x39   : > { %364 = vmatpush.msra.mxu1 %v314_v1  ;;  %v306_v8 = vld [vmem:[%s249_s2] sm:$0xff]  ;;  %v319_v9 = vld [vmem:[#allocation13] sm:$0x7]  ;;  %764 = vset.pattern.permute.xlu2 %v987_v16  ;;  %v312_v20 = vld [vmem:[#allocation11 + $0x28] sm:$0xff]  ;;  %396 = vst.msk [vmem:[#allocation6] sm:$0xff] %vm394_vm1, %v989_v28  ;;  %s515_s25 = scalar_lea.hbm %s1196_s4, %s666_s22  ;;  %s517_s30 = sshll.u32 %s299_s21, 4  ;;  %s518_s30 = int_to_ptr.vmem [resolvable:$true] %s517_s30 }
  0x3a   : > { %344 = vmatpush.msra.mxu0 %v313_v3  ;;  %v322_v10 = vperm.slane %v319_v9, 1  ;;  %v321_v11 = vperm.slane %v319_v9, 0  ;;  %v318_v17 = vld [vmem:[#allocation11 + $0x58] sm:$0xff]  ;;  %v315_v18 = vld [vmem:[#allocation11 + $0x40] sm:$0xff]  ;;  %v309_v21 = vld [vmem:[#allocation11 + $0x10] sm:$0xff]  ;;  %v323_v33 = vperm.slane %v319_v9, 2 }
  0x3b   : > { %365 = vmatpush.msra.mxu1 %v311_v4  ;;  %383 = vmatpush.msra.mxu2 %v318_v17  ;;  %v424_v22 = vld [vmem:[%s1135_s26] sm:$0x3]  ;;  %s519_s5 = sshll.u32 %s515_s25, 4  ;;  %s505_s6 = scalar_lea.sflag [#allocation10], %s1119_s13  ;;  %s520_s5 = int_to_ptr.hbm [resolvable:$true] %s519_s5 }
  0x3c   : > { %345 = vmatpush.msra.mxu0 %v310_v5  ;;  %vm425_vm2 = vnez %v424_v22  ;;  %s905_s7 = sshra.s32 %s520_s5, 4  ;;  %s911_s10 = scalar_lea.hbm %s1196_s4, 16  ;;  %s906_s7 = int_to_ptr.hbm [resolvable:$true] %s905_s7 }
  0x3d   : > { %366 = vmatpush.msra.mxu1 %v308_v6  ;;  %384 = vmatpush.msra.mxu2 %v315_v18  ;;  %v426_v23 = vsel %vm425_vm2, 16843009, %v987_v16  ;;  %s907_s18 = scalar_lea.hbm %s906_s7, 8  ;;  %p912_p10 = scmp.lt.s32.totalorder %s906_s7, %s1196_s4 }
  0x3e   : > { %346 = vmatpush.msra.mxu0 %v307_v7  ;;  %662 = vmatmul.msk.f32.vlgmr.msra.gmra.mxu1 %vm327_vm0, %v306_v8  ;;  %v427_v24 = vunpack.c.0.s8 %v426_v23  ;;  %p908_p1 = scmp.ne.s32.totalorder %s906_s7, %s907_s18  ;;  %p913_p11 = scmp.lt.s32.totalorder %s911_s10, %s907_s18 }
  0x3f   : > { %661 = vmatmul.msk.f32.vlgmr.msra.gmra.mxu0 %vm327_vm0, %v306_v8  ;;  %385 = vmatpush.msra.mxu2 %v312_v20  ;;  %v430_v29 = vld [vmem:[#allocation5] sm:$0xff] }
  0x40   : > { %vm428_vm3 = vcmp.ne.s32.totalorder %v427_v24, 0  ;;  %v447_v43 = vld [vmem:[#allocation6] sm:$0xff]  ;;  %p909_p3 = pnand %p908_p1, %p1093_p2  ;;  %p914_p12 = por %p913_p11, %p912_p10 }
  0x41   : > { %386 = vmatpush.msra.mxu2 %v309_v21 }
  0x42   : > { %663 = vmatmul.msk.f32.vlgmr.msra.gmra.mxu2 %vm327_vm0, %v306_v8  ;;  %p910_p9 = pneg %p909_p3 }
  0x44   : > { %p915_p13 = pnand %p914_p12, %p910_p9 }
  0xbb   : > { %v368_v12 = vpop.f32.mrf.mxu1 }
  0xbc   : > { %v348_v13 = vpop.f32.mrf.mxu0  ;;  %v369_v14 = vadd.f32 %v368_v12, %v322_v10 }
  0xbd   : > { %v349_v15 = vadd.f32 %v348_v13, %v321_v11 }
  0xbe   : > { %419 = vmatpush.xpose.msra.mxu3 %v369_v14 }
  0xc1   : > { %420 = vmatmul.f32.vlgmr.msra.gmra.mxu3 %v349_v15 }
  0xc5   : > { %v388_v34 = vpop.f32.mrf.mxu2 }
  0xc6   : > { %v389_v35 = vadd.f32 %v388_v34, %v323_v33 }
  0xc8   : > { %480 = vmatpush.msrb.mxu3 %v389_v35 }
 0x144   : > { %v421_v25 = vpop.f32.mrf.mxu3 }
 0x145   : > { %v429_v26 = vsel %vm428_vm3, -1e+09, %v421_v25 }
 0x146   : > { %v432_v27 = vsel %vm431_vm4, %v429_v26, -inf }
 0x147   : > { %433 = vmax.xlane.f32.xlu0 %v432_v27 }
 0x1ba   : > { %v434_v30 = vpop.xlane.xlu0 %433 }
 0x1bb   : > { %v435_v31 = vmax.f32 %v430_v29, %v434_v30 }
 0x1bd   : > { %v436_v32 = vsub.f32 %v430_v29, %v435_v31  ;;  %487 = vst.msk [vmem:[#allocation5] sm:$0xff] %vm394_vm1, %v435_v31  ;;  %441 = vperm.xlu0 %762, %v435_v31  }
 0x1bf   : > { %v437_v41 = vmul.f32 1.442695, %v436_v32 }
 0x22f   : > { %v442_v36 = vpop.permute.xlu0 %441 }
 0x230   : > { %v444_v37 = vsub.f32 %v429_v26, %v442_v36 }
 0x232   : > { %v445_v38 = vmul.f32 1.442695, %v444_v37 }
 0x234   : > { %765 = vpow2.f32 %v445_v38 }
 0x235   : > { %767 = vpow2.f32 %v437_v41 }
 0x23a   : > { %v766_v39 = vpop.eup %765 }
 0x23b   : > { %664 = vmatmul.msk.f32.vlgmr.msrb.gmra.mxu3 %vm431_vm4, %v766_v39  ;;  %v449_v40 = vsel %vm431_vm4, %v766_v39, 0.0  ;;  %v768_v42 = vpop.eup %767 }
 0x23c   : > { %450 = vadd.xlane.f32.xlu1 %v449_v40  ;;  %v448_v44 = vmul.f32 %v768_v42, %v447_v43 }
 0x255   : > { %458 = vperm.xlu1 %763, %v768_v42  }
 0x2af   : > { %v451_v45 = vpop.xlane.xlu1 %450 }
 0x2b0   : > { %v452_v46 = vadd.f32 %v451_v45, %v448_v44 }
 0x2b2   : > { %454 = vst.msk [vmem:[#allocation6] sm:$0xff] %vm394_vm1, %v452_v46 }
 0x2b9   : > { %v491_v47 = vld [vmem:[#allocation6] sm:$0xff] }
 0x2ba   : > { %769 = vrcp.f32 %v491_v47 }
 0x2be   : > { %v482_v54 = vpop.f32.mrf.mxu3 }
 0x2c0   : > { %v770_v48 = vpop.eup %769 }
 0x2c1   : > { %v493_v49 = vmul.f32 %v770_v48, %v491_v47 }
 0x2c3   : > { %v494_v50 = vsub.f32 2.0, %v493_v49 }
 0x2c5   : > { %v495_v51 = vmul.f32 %v770_v48, %v494_v50 }
 0x2c7   : > { %499 = vperm.xlu2 %764, %v495_v51   ;;  %v459_v52 = vpop.permute.xlu1 %458 }
 0x2c8   : > { %v461_v53 = vmul.f32 0.0, %v459_v52 }
 0x2ca   : > { %v485_v55 = vadd.f32 %v482_v54, %v461_v53 }
 0x321   : > { %v500_v56 = vpop.permute.xlu2 %499 }
 0x322   : > { %v502_v57 = vmul.f32 %v500_v56, %v485_v55 }
 0x324   : > { %503 = vst [vmem:[%s299_s21] sm:$0xff] %v502_v57 }
 0x325   : > { %918 = shalt.err (!%p915_p13)
}
 0x326   : > { %681 = dma.vmem_to_hbm [thread:$0]  (%p1093_p2), %s518_s30, 128, %s520_s5, %s505_s6  }
 0x327 PF: > { %s1215_s28 = sld [smem:[#allocation22_spill]]  ;;  %s531_s13 = sand.u32 1, %s961_s15  }
 0x328   : > { %p698_p0 = pnand %p650_p6, %p1100_p5  ;;  %s532_s29 = scalar_lea.sflag [#allocation10], %s531_s13 }
 0x32a   : > { %p699_p4 = pneg %p698_p0 }
 0x32c   : > { %956 = dma.done.wait (%p699_p4), %s532_s29, 128  }
 0x32d   : > { %958 = vsyncadd (%p699_p4), %s532_s29, 4294967168  ;;  %s24_s20 = sadd.s32 1, %s1215_s28   ;;  %s1216_s1 = sld [smem:[#allocation21_spill]] }
 0x32e   : > { %p21_p7 = scmp.ge.s32.totalorder %s24_s20, 4   ;;  %s1217_s17 = sld [smem:[#allocation24_spill]] }
 0x32f   : > { %s1218_s24 = sld [smem:[#allocation23_spill]]  ;;  %s1219_s15 = smov %s965_s16 }
 0x330   : > { %s1221_s18 = smov %s977_s19 }
 0x331   :  { %23 = sbr.rel (!%p21_p7) target bundleno = 12 (0xc), region = 112 }
 0x333   : > { %s1220_s16 = smov %s1216_s1 }
 0x335   : > { %s1222_s19 = smov %s1218_s24 }
 0x336   :  { %538 = vsyncpa [#allocation9], 1 }
 0x337   :  { %540 = vsyncpa [#allocation9 + $0x1], 1 }
 0x338   :  { %541 = vsyncpa [#allocation12], 1 }
 0x339   :  { %542 = vsyncpa [#allocation15], 1 }
 0x33a   :  { %544 = vsyncpa [#allocation15 + $0x1], 1 }
 0x33b   :  { %545 = vsyncpa [#allocation10], 1 }
 0x33c   :  { %547 = vsyncpa [#allocation10 + $0x1], 1 }

</bundles_post_ra>
